<compile_context>
chip_gen: v7x
topology: tpu7x:2x2x1
jax: 0.10.0
libtpu: 0.0.40
codegen_flags: <defaults>
</compile_context>

<pallas_src>
import jax
import jax.numpy as jnp
from jax.experimental import pallas as pl
from jax.experimental.pallas import tpu as pltpu


_TARGET_BLOCK_BYTES = 4 * 1024 * 1024   # ~4 MiB per block buffer
_MAX_COL_BLOCK = 2048                   # lane-dense col block cap (multiple of 128)
_MAX_ROW_BLOCK = 1024                   # row block cap (multiple of 32/16/8)
_MIN_SPLIT_BYTES = 1 * 1024 * 1024      # only split 1-block grids above this size
_VMEM_LIMIT_CAP = 32 * 1024 * 1024      # safe on v7x (64 MiB VMEM) and v5e/v6e
_VMEM_LIMIT_FLOOR = 16 * 1024 * 1024


# ---------------- kernel ----------------

def _add_bias_kernel(x_ref, b_ref, o_ref):
    # x: (Rblk, Cblk); b: (1, Cblk) or (Rblk, 1) -> jnp broadcast add (VPU).
    o_ref[...] = x_ref[...] + b_ref[...]


# ---------------- tiling helpers ----------------

def _choose_blocks(rows, cols, itemsize):
    """Pick (row_blk, col_blk) obeying the (8,128) block rule and ~4 MiB budget."""
    # dtype-native sublane packing: 8 rows (f32), 16 (bf16), 32 (int8/fp8).
    row_mult = max(8, 32 // max(1, itemsize))

    # Column block: full width when it fits the cap (full extent is always
    # legal, aligned or not); otherwise a lane-dense 128-multiple block and
    # Pallas masks the ragged last block.
    col_blk = cols if cols <= _MAX_COL_BLOCK else _MAX_COL_BLOCK

    # Row block: multiple of row_mult sized to the byte budget, or the full
    # row extent when already small enough.
    rows_budget = max(row_mult, _TARGET_BLOCK_BYTES // max(1, col_blk * itemsize))
    rows_budget = (rows_budget // row_mult) * row_mult
    row_cap = min(_MAX_ROW_BLOCK, rows_budget)
    row_blk = rows if rows <= row_cap else row_cap

    # v7x megacore: if the whole array fits a single block but is big enough
    # that per-step overhead is negligible, split rows so both TensorCores
    # can stream concurrently (harmless serial loop on 1-TC v5e/v6e).
    total_bytes = rows * cols * itemsize
    if (pl.cdiv(rows, row_blk) == 1 and pl.cdiv(cols, col_blk) == 1
            and rows >= 2 * row_mult and total_bytes >= _MIN_SPLIT_BYTES):
        half = pl.cdiv(rows, 2)
        row_blk = ((half + row_mult - 1) // row_mult) * row_mult

    return row_blk, col_blk


def _vmem_limit_bytes(row_blk, col_blk, itemsize):
    padded_rows = ((row_blk + 7) // 8) * 8
    padded_cols = ((col_blk + 127) // 128) * 128
    block_bytes = padded_rows * padded_cols * itemsize
    # in + out double-buffered (4 block buffers) + bias buffers + slack.
    need = 4 * block_bytes + (6 << 20)
    return int(min(_VMEM_LIMIT_CAP, max(_VMEM_LIMIT_FLOOR, need)))


def _tiled_bias_add(x2d, bias2d, *, bias_is_col, donate_x=False):
    rows, cols = x2d.shape
    itemsize = x2d.dtype.itemsize
    row_blk, col_blk = _choose_blocks(rows, cols, itemsize)
    n_row = pl.cdiv(rows, row_blk)
    n_col = pl.cdiv(cols, col_blk)

    if bias_is_col:
        # bias (1, cols): varies with the column block -> put columns on the
        # OUTER grid axis so the bias tile is DMA'd once per column block
        # (Pallas skips the copy while its block index is unchanged).
        grid = (n_col, n_row)
        x_spec = pl.BlockSpec((row_blk, col_blk), lambda jc, ir: (ir, jc))
        b_spec = pl.BlockSpec((1, col_blk), lambda jc, ir: (0, jc))
    else:
        # bias (rows, 1): varies with the row block -> rows already outermost,
        # bias tile fetched once per row block.
        grid = (n_row, n_col)
        x_spec = pl.BlockSpec((row_blk, col_blk), lambda ir, jc: (ir, jc))
        b_spec = pl.BlockSpec((row_blk, 1), lambda ir, jc: (ir, 0))
    out_spec = x_spec

    return pl.pallas_call(
        _add_bias_kernel,
        out_shape=jax.ShapeDtypeStruct((rows, cols), x2d.dtype),
        grid_spec=pltpu.PrefetchScalarGridSpec(
            num_scalar_prefetch=0,
            grid=grid,
            in_specs=[x_spec, b_spec],
            out_specs=out_spec,
        ),
        compiler_params=pltpu.CompilerParams(
            dimension_semantics=("parallel", "parallel"),
            vmem_limit_bytes=_vmem_limit_bytes(row_blk, col_blk, itemsize),
        ),
        input_output_aliases=({0: 0} if donate_x else {}),
    )(x2d, bias2d)


# ---------------- public wrapper ----------------

def add_bias(x, bias, *, donate_x=False):
    """Pallas equivalent of AddBias.forward.

    `bias` may be the 1-D pre-unsqueeze parameter (F,) or the stored (F, 1)
    parameter.  Set donate_x=True to alias x's buffer into the output when the
    caller donates x.
    """
    b = bias.reshape(-1).astype(x.dtype)
    if x.ndim == 2:
        B, F = x.shape
        if F < 128:
            # Tiny feature dim: standalone kernel would waste >97% of lanes;
            # plain XLA add fuses into the adjacent op anyway.
            return x + b.reshape(1, F)
        return _tiled_bias_add(x, b.reshape(1, F), bias_is_col=True,
                               donate_x=donate_x)
    elif x.ndim == 4:
        N, C, H, W = x.shape
        if H * W < 128:
            # Too narrow on the lane axis to be worth a dedicated kernel.
            return x + b.reshape(1, C, 1, 1)
        # Contiguous NCHW flatten: rows = N*C (sublanes), cols = H*W (lanes).
        x2d = x.reshape(N * C, H * W)
        # Per-row bias (N*C elements, tiny).  When add_bias is called under the
        # caller's jit this broadcast+reshape fuses into the same program.
        b_rows = jnp.broadcast_to(b.reshape(1, C), (N, C)).reshape(N * C, 1)
        out2d = _tiled_bias_add(x2d, b_rows, bias_is_col=False,
                                donate_x=donate_x)
        return out2d.reshape(N, C, H, W)
    else:
        raise ValueError("AddBias supports 2-D or 4-D inputs only.")


# ---------------- demo ----------------

if __name__ == "__main__":
    key = jax.random.PRNGKey(0)
    k1, k2, k3, k4, k5, k6, k7 = jax.random.split(key, 7)

    # --- 4-D NCHW path (module's conv branch): N=2, C=4, H=W=16 ---
    C = 4
    bias_c = jax.random.normal(k1, (C,), dtype=jnp.float32)
    x4 = jax.random.normal(k2, (2, C, 16, 16), dtype=jnp.float32)
    y4 = jax.block_until_ready(add_bias(x4, bias_c))
    ref4 = x4 + bias_c.reshape(1, C, 1, 1)
    assert jnp.allclose(y4, ref4, atol=1e-6), "4D mismatch"

    # --- larger 4-D case: exercises the 2-block row split (v7x megacore) ---
    C2 = 64
    bias_c2 = jax.random.normal(k3, (C2,), dtype=jnp.float32)
    x4b = jax.random.normal(k4, (16, C2, 16, 16), dtype=jnp.float32)  # rows=1024
    y4b = jax.block_until_ready(add_bias(x4b, bias_c2))
    ref4b = x4b + bias_c2.reshape(1, C2, 1, 1)
    assert jnp.allclose(y4b, ref4b, atol=1e-6), "tiled 4D mismatch"

    # --- 2-D path with lane-dense F (kernel path): B=16, F=256 ---
    F = 256
    bias_f = jax.random.normal(k5, (F,), dtype=jnp.float32)
    x2 = jax.random.normal(k1, (16, F), dtype=jnp.float32)
    y2 = jax.block_until_ready(add_bias(x2, bias_f))
    ref2 = x2 + bias_f.reshape(1, F)
    assert jnp.allclose(y2, ref2, atol=1e-6), "2D mismatch"

    # --- 2-D wide, non-128-aligned F: multi-col-block grid + ragged tail ---
    Fw = 2200  # > _MAX_COL_BLOCK and not a multiple of 128
    bias_fw = jax.random.normal(k6, (Fw,), dtype=jnp.float32)
    x2w = jax.random.normal(k7, (64, Fw), dtype=jnp.float32)
    y2w = jax.block_until_ready(add_bias(x2w, bias_fw))
    ref2w = x2w + bias_fw.reshape(1, Fw)
    assert jnp.allclose(y2w, ref2w, atol=1e-6), "wide-2D mismatch"

    # --- bf16 2-D path (exercises dtype-aware sublane rounding) ---
    x2h = jax.random.normal(k2, (32, F), dtype=jnp.bfloat16)
    y2h = jax.block_until_ready(add_bias(x2h, bias_f))
    ref2h = x2h + bias_f.astype(jnp.bfloat16).reshape(1, F)
    assert jnp.allclose(y2h.astype(jnp.float32), ref2h.astype(jnp.float32),
                        atol=1e-2), "bf16-2D mismatch"

    # --- 2-D tiny F (deliberate plain-XLA fallback): B=2, F=4 ---
    x2s = jax.random.normal(k2, (2, C), dtype=jnp.float32)
    y2s = jax.block_until_ready(add_bias(x2s, bias_c))
    ref2s = x2s + bias_c.reshape(1, C)
    assert jnp.allclose(y2s, ref2s, atol=1e-6), "small-2D mismatch"

    # --- 4-D tiny spatial (deliberate plain-XLA fallback): H*W < 128 ---
    x4s = jax.random.normal(k3, (2, C, 8, 8), dtype=jnp.float32)
    y4s = jax.block_until_ready(add_bias(x4s, bias_c))
    ref4s = x4s + bias_c.reshape(1, C, 1, 1)
    assert jnp.allclose(y4s, ref4s, atol=1e-6), "small-4D mismatch"

    print("KERNEL_OK")
</pallas_src>

<mosaic_0001>
module attributes {stable_mosaic.version = 11 : i64} {
  func.func @_add_bias_kernel(%arg0: i32, %arg1: i32, %arg2: memref<8x256xf32, #tpu.memory_space<vmem>>, %arg3: memref<8x1xf32, #tpu.memory_space<vmem>>, %arg4: memref<8x256xf32, #tpu.memory_space<vmem>>) attributes {dimension_semantics = [#tpu.dimension_semantics<parallel>, #tpu.dimension_semantics<parallel>], iteration_bounds = array<i64: 1, 1>, scalar_prefetch = 0 : i64, scratch_operands = 0 : i64, tpu.core_type = #tpu.core_type<tc>, window_params = [{transform_indices = @transform_0, window_bounds = array<i64: 8, 256>}, {transform_indices = @transform_1, window_bounds = array<i64: 8, 1>}, {transform_indices = @transform_2, window_bounds = array<i64: 8, 256>}]} {
    %c0 = arith.constant 0 : index
    %c0_0 = arith.constant 0 : index
    %0 = vector.load %arg2[%c0, %c0_0] : memref<8x256xf32, #tpu.memory_space<vmem>>, vector<8x256xf32>
    %c0_1 = arith.constant 0 : index
    %c0_2 = arith.constant 0 : index
    %1 = vector.load %arg3[%c0_1, %c0_2] : memref<8x1xf32, #tpu.memory_space<vmem>>, vector<8x1xf32>
    %2 = vector.broadcast %1 : vector<8x1xf32> to vector<8x256xf32>
    %3 = arith.addf %0, %2 : vector<8x256xf32>
    %c0_3 = arith.constant 0 : index
    %c0_4 = arith.constant 0 : index
    %4 = vector.load %arg4[%c0_3, %c0_4] : memref<8x256xf32, #tpu.memory_space<vmem>>, vector<8x256xf32>
    tpu.vector_store %arg4[%c0_3, %c0_4], %3 {strides = array<i32>} : memref<8x256xf32, #tpu.memory_space<vmem>>, vector<8x256xf32>,
    return
  }
  func.func @transform_0(%arg0: i32, %arg1: i32) -> (i32, i32) {
    %c0_i32 = arith.constant 0 : i32
    return %arg0, %arg1 : i32, i32
  }
  func.func @transform_1(%arg0: i32, %arg1: i32) -> (i32, i32) {
    %c0_i32 = arith.constant 0 : i32
    %c0_i32_0 = arith.constant 0 : i32
    return %arg0, %c0_i32 : i32, i32
  }
  func.func @transform_2(%arg0: i32, %arg1: i32) -> (i32, i32) {
    %c0_i32 = arith.constant 0 : i32
    return %arg0, %arg1 : i32, i32
  }
}

</mosaic_0001>

<bundles_post_ra>
// kernel: tpu_custom_call.1
= control target key start
LH: loop header
LB: loop body
LE: loop exit
PB: predicated region body
PF: predicated region fallthrough
CT: control target
= control target key end

     0   :  { %7 = vsyncpa [#allocation3], 0  ;;  %s148_s0 = inlined_call_operand.hbm [shape: f32[8,256], index: 0, kind: input, shape index: {}]   ;;  %s149_s1 = inlined_call_operand.vmem [shape: f32[8,1], index: 1, kind: input, shape index: {}]   ;;  %s150_s2 = inlined_call_operand.hbm [shape: f32[8,256], index: 2, kind: output, shape index: {}]  }
   0x1   :  { %8 = vsyncpa [#allocation4], 0  ;;  %s103_s9 = smov [#allocation2]   ;;  %s55_s13 = scalar_lea.hbm %s148_s0, 256 }
   0x2   :  { %s15_s10 = sshll.u32 %s103_s9, 4  ;;  %p56_p0 = scmp.ne.s32.totalorder %s148_s0, %s55_s13  ;;  %s16_s10 = int_to_ptr.vmem [resolvable:$true] %s15_s10 }
   0x3   :  { %p59_p1 = scmp.lt.u32.totalorder %s55_s13, %s148_s0 }
   0x5   :  { %p61_p2 = pnand %p59_p1, %p56_p0 }
   0x7   :  { %64 = shalt.err (!%p61_p2)
}
   0x8   :  { %s65_s18 = scalar_lea.vmem %s16_s10, 256  ;;  %p70_p4 = scmp.lt.s32.totalorder %s16_s10, %s16_s10 }
   0x9   :  { %p66_p3 = scmp.ne.s32.totalorder %s16_s10, %s65_s18  ;;  %p71_p5 = scmp.lt.s32.totalorder %s65_s18, %s65_s18 }
   0xb   :  { %p72_p6 = por %p71_p5, %p70_p4 }
   0xd   :  { %p73_p7 = pnand %p72_p6, %p66_p3 }
   0xf   :  { %76 = shalt.err (!%p73_p7)
}
  0x10   :  { %18 = dma.hbm_to_vmem [thread:$0]  %s148_s0, 256, %s16_s10, [#allocation3]  }
  0x11   :  { %99 = dma.done.wait [#allocation3], 256  }
  0x12   :  { %100 = vsyncadd [#allocation3], 4294967040  ;;  %v104_v0 = vmov 0   ;;  %v26_v1 = vld [vmem:[%s149_s1] sm:$0xff]  ;;  %v25_v3 = vld [vmem:[#allocation2 + $0x8] sm:$0xff]  ;;  %s105_s23 = smov [#allocation5]  }
  0x13   :  { %54 = vset.pattern.permute.xlu0 %v104_v0  ;;  %v24_v2 = vld [vmem:[#allocation2] sm:$0xff]  ;;  %s42_s24 = sshll.u32 %s105_s23, 4  ;;  %s43_s24 = int_to_ptr.vmem [resolvable:$true] %s42_s24 }
  0x14   :  { %29 = vperm.xlu0 %54, %v26_v1   ;;  %s77_s0 = scalar_lea.vmem %s43_s24, 256  ;;  %p82_p9 = scmp.lt.s32.totalorder %s43_s24, %s43_s24 }
  0x15   :  { %p78_p8 = scmp.ne.s32.totalorder %s43_s24, %s77_s0  ;;  %p83_p10 = scmp.lt.s32.totalorder %s77_s0, %s77_s0 }
  0x17   :  { %p84_p11 = por %p83_p10, %p82_p9 }
  0x19   :  { %p85_p12 = pnand %p84_p11, %p78_p8 }
  0x93   :  { %v30_v4 = vpop.permute.xlu0 %29 }
  0x94   :  { %v32_v5 = vadd.f32 %v30_v4, %v24_v2  ;;  %v33_v6 = vadd.f32 %v30_v4, %v25_v3 }
  0x96   :  { %34 = vst [vmem:[#allocation5] sm:$0xff] %v32_v5  ;;  %35 = vst [vmem:[#allocation5 + $0x8] sm:$0xff] %v33_v6 }
  0x97   :  { %88 = shalt.err (!%p85_p12)
}
  0x98   :  { %s89_s26 = scalar_lea.hbm %s150_s2, 256 }
  0x99   :  { %p90_p13 = scmp.ne.s32.totalorder %s150_s2, %s89_s26  ;;  %p93_p0 = scmp.lt.u32.totalorder %s89_s26, %s150_s2 }
  0x9b   :  { %p95_p1 = pnand %p93_p0, %p90_p13 }
  0x9d   :  { %98 = shalt.err (!%p95_p1)
}
  0x9e   :  { %45 = dma.vmem_to_hbm [thread:$0]  %s43_s24, 256, %s150_s2, [#allocation4]  }
  0x9f   :  { %101 = dma.done.wait [#allocation4], 256  }
  0xa0   :  { %102 = vsyncadd [#allocation4], 4294967040 }
  0xa1   :  { %49 = vsyncpa [#allocation3], 1 }
  0xa2   :  { %50 = vsyncpa [#allocation4], 1 }

</bundles_post_ra>
